<compile_context>
chip_gen: v5e
topology: v5e:2x2
jax: 0.10.0
libtpu: 0.0.40
codegen_flags: <defaults>
</compile_context>

<pallas_src>
import functools

import jax
import jax.numpy as jnp
from jax import lax
from jax.experimental import pallas as pl
from jax.experimental.pallas import tpu as pltpu

HIDDEN = 768     # BERT pooled output size
MID = 64         # l1 output size
N_OUT = 2        # n_outputs
LN_EPS = 1e-5    # torch.nn.LayerNorm default


def _round_up(n, m):
    return ((n + m - 1) // m) * m


def _head_kernel(x_ref, w1_ref, b1_ref, g_ref, beta_ref, w2_ref, b2_ref, o_ref):
    # x arrives at its producer dtype; bf16 cast (VPU) hides under the x DMA.
    x = x_ref[...].astype(jnp.bfloat16)

    # l1: Linear(768 -> 64).  bf16 operands, f32 accumulation on the MXU.
    h = jnp.dot(x, w1_ref[...], preferred_element_type=jnp.float32) + b1_ref[...]

    # bn1: LayerNorm(64) over the last axis (biased variance, torch eps), f32.
    mean = jnp.mean(h, axis=-1, keepdims=True)
    centered = h - mean
    var = jnp.mean(centered * centered, axis=-1, keepdims=True)
    h = centered * lax.rsqrt(var + LN_EPS)
    h = h * g_ref[...] + beta_ref[...]

    # Tanh (EUP slot; free relative to the HBM-bound x stream).
    h = jnp.tanh(h)

    # l2: Linear(64 -> 2).  bf16 operands (single-pass MXU), f32 accumulation.
    out = jnp.dot(h.astype(jnp.bfloat16), w2_ref[...],
                  preferred_element_type=jnp.float32) + b2_ref[...]
    o_ref[...] = out.astype(o_ref.dtype)


@functools.lru_cache(maxsize=None)
def _tile_policy():
    """Per-generation (tile_b cap, vmem_limit_bytes)."""
    try:
        kind = jax.devices()[0].device_kind.lower()
    except Exception:  # pragma: no cover - defensive; fall back to defaults
        kind = ""
    if "v6" in kind:
        # 128 MiB VMEM, 1.35 TB/s HBM -> bigger tiles amortize ~0.35us/step.
        return 4096, 64 << 20
    if "v5 lite" in kind or "v5e" in kind:
        # 16 MiB default scoped VMEM; at 0.82 TB/s step overhead is already small.
        return 1024, 24 << 20
    # v7x (64 MiB VMEM/TC) and anything else: moderate tiles; >=4 grid steps
    # are enforced below so both TensorCores get work from the parallel axis.
    return 2048, 40 << 20


def legalbert_classifier_head(x, params, *, tile_b=None):
    """x: [B, 768] pooled BERT features (any float dtype). Returns [B, 2] f32."""
    B = x.shape[0]
    cap, vmem_limit = _tile_policy()
    if tile_b is None:
        tile_b = min(cap, _round_up(max(B, 8), 8))
        # Prefer >= 4 grid steps (when the batch allows) so the single
        # "parallel" axis shards across both v7x TensorCores.
        while tile_b > 256 and pl.cdiv(B, tile_b) < 4:
            tile_b = _round_up(tile_b // 2, 8)
    tile_b = max(8, _round_up(tile_b, 8))
    n_tiles = pl.cdiv(B, tile_b)   # ragged last block handled by Pallas

    # Tiny, one-time parameter casts (the big x stream is untouched here).
    w1 = params["w1"].astype(jnp.bfloat16)
    b1 = params["b1"].astype(jnp.float32)
    gamma = params["gamma"].astype(jnp.float32)
    beta = params["beta"].astype(jnp.float32)
    w2 = params["w2"].astype(jnp.bfloat16)
    b2 = params["b2"].astype(jnp.float32)

    cost = pl.CostEstimate(
        flops=2 * B * HIDDEN * MID + 2 * B * MID * N_OUT,
        transcendentals=B * MID,
        bytes_accessed=(B * HIDDEN * x.dtype.itemsize   # x stream (dominant)
                        + HIDDEN * MID * 2              # w1 (bf16, resident)
                        + (3 * MID + N_OUT) * 4 + MID * N_OUT * 2
                        + B * N_OUT * 4),               # narrow output
    )

    # Constant index_maps keep weights/biases VMEM-resident across grid steps.
    const = lambda shape: pl.BlockSpec(shape, lambda i: (0, 0))

    out = pl.pallas_call(
        _head_kernel,
        out_shape=jax.ShapeDtypeStruct((B, N_OUT), jnp.float32),
        grid=(n_tiles,),
        in_specs=[
            pl.BlockSpec((tile_b, HIDDEN), lambda i: (i, 0)),  # x (streamed)
            const((HIDDEN, MID)),                              # w1
            const((1, MID)),                                   # b1
            const((1, MID)),                                   # gamma
            const((1, MID)),                                   # beta
            const((MID, N_OUT)),                               # w2
            const((1, N_OUT)),                                 # b2
        ],
        # Narrow out_spec: last block dim == full array dim (legal); no padded
        # zero writeback, no wrapper-side slice.
        out_specs=pl.BlockSpec((tile_b, N_OUT), lambda i: (i, 0)),
        compiler_params=pltpu.CompilerParams(
            dimension_semantics=("parallel",),
            vmem_limit_bytes=vmem_limit),
        cost_estimate=cost,
    )(x, w1, b1, gamma, beta, w2, b2)

    return out


def init_params(key):
    """Deterministic init mimicking torch.nn.Linear defaults."""
    k1, k2, k3, k4 = jax.random.split(key, 4)
    lim1 = 1.0 / jnp.sqrt(jnp.float32(HIDDEN))
    lim2 = 1.0 / jnp.sqrt(jnp.float32(MID))
    return {
        "w1": jax.random.uniform(k1, (HIDDEN, MID), jnp.float32, -lim1, lim1),
        "b1": jax.random.uniform(k2, (1, MID), jnp.float32, -lim1, lim1),
        "gamma": jnp.ones((1, MID), jnp.float32),   # LayerNorm weight
        "beta": jnp.zeros((1, MID), jnp.float32),   # LayerNorm bias
        "w2": jax.random.uniform(k3, (MID, N_OUT), jnp.float32, -lim2, lim2),
        "b2": jax.random.uniform(k4, (1, N_OUT), jnp.float32, -lim2, lim2),
    }


def _reference(x, p):
    """Pure-JAX reference mirroring the kernel's precision choices."""
    xb = x.astype(jnp.bfloat16).astype(jnp.float32)
    w1 = p["w1"].astype(jnp.bfloat16).astype(jnp.float32)
    h = xb @ w1 + p["b1"]
    mean = jnp.mean(h, axis=-1, keepdims=True)
    var = jnp.mean((h - mean) ** 2, axis=-1, keepdims=True)
    h = (h - mean) / jnp.sqrt(var + LN_EPS) * p["gamma"] + p["beta"]
    h = jnp.tanh(h)
    hb = h.astype(jnp.bfloat16).astype(jnp.float32)
    w2 = p["w2"].astype(jnp.bfloat16).astype(jnp.float32)
    return hb @ w2 + p["b2"]


if __name__ == "__main__":
    key = jax.random.PRNGKey(0)
    kx, kp, kx2 = jax.random.split(key, 3)
    params = init_params(kp)

    # Case 1: small batch, single grid step, blocks equal full array dims.
    B1 = 8
    x1 = jax.random.normal(kx, (B1, HIDDEN), jnp.float32)
    out1 = jax.block_until_ready(legalbert_classifier_head(x1, params))
    ref1 = _reference(x1, params)
    assert out1.shape == (B1, N_OUT), out1.shape
    assert jnp.allclose(out1, ref1, atol=2e-3, rtol=2e-3), (
        float(jnp.max(jnp.abs(out1 - ref1))))

    # Case 2: batch not a multiple of the tile -> ragged last block exercised
    # (OOB garbage rows must stay confined to discarded output rows).
    B2 = 50
    x2 = jax.random.normal(kx2, (B2, HIDDEN), jnp.float32)
    out2 = jax.block_until_ready(
        legalbert_classifier_head(x2, params, tile_b=16))
    ref2 = _reference(x2, params)
    assert out2.shape == (B2, N_OUT), out2.shape
    assert bool(jnp.all(jnp.isfinite(out2)))
    assert jnp.allclose(out2, ref2, atol=2e-3, rtol=2e-3), (
        float(jnp.max(jnp.abs(out2 - ref2))))

    print("KERNEL_OK")
</pallas_src>

<mosaic_0001>
module attributes {stable_mosaic.version = 11 : i64} {
  func.func @_head_kernel(%arg0: i32, %arg1: memref<8x768xf32, #tpu.memory_space<vmem>>, %arg2: memref<768x64xbf16, #tpu.memory_space<vmem>>, %arg3: memref<1x64xf32, #tpu.memory_space<vmem>>, %arg4: memref<1x64xf32, #tpu.memory_space<vmem>>, %arg5: memref<1x64xf32, #tpu.memory_space<vmem>>, %arg6: memref<64x2xbf16, #tpu.memory_space<vmem>>, %arg7: memref<1x2xf32, #tpu.memory_space<vmem>>, %arg8: memref<8x2xf32, #tpu.memory_space<vmem>>) attributes {dimension_semantics = [#tpu.dimension_semantics<parallel>], iteration_bounds = array<i64: 1>, scalar_prefetch = 0 : i64, scratch_operands = 0 : i64, tpu.core_type = #tpu.core_type<tc>, window_params = [{transform_indices = @transform_0, window_bounds = array<i64: 8, 768>}, {pipeline_mode = #tpu.pipeline_mode<synchronous>, transform_indices = @transform_1, window_bounds = array<i64: 768, 64>}, {pipeline_mode = #tpu.pipeline_mode<synchronous>, transform_indices = @transform_2, window_bounds = array<i64: 1, 64>}, {pipeline_mode = #tpu.pipeline_mode<synchronous>, transform_indices = @transform_3, window_bounds = array<i64: 1, 64>}, {pipeline_mode = #tpu.pipeline_mode<synchronous>, transform_indices = @transform_4, window_bounds = array<i64: 1, 64>}, {pipeline_mode = #tpu.pipeline_mode<synchronous>, transform_indices = @transform_5, window_bounds = array<i64: 64, 2>}, {pipeline_mode = #tpu.pipeline_mode<synchronous>, transform_indices = @transform_6, window_bounds = array<i64: 1, 2>}, {transform_indices = @transform_7, window_bounds = array<i64: 8, 2>}]} {
    %c0 = arith.constant 0 : index
    %c0_0 = arith.constant 0 : index
    %0 = vector.load %arg1[%c0, %c0_0] : memref<8x768xf32, #tpu.memory_space<vmem>>, vector<8x768xf32>
    %1 = arith.truncf %0 : vector<8x768xf32> to vector<8x768xbf16>
    %c0_1 = arith.constant 0 : index
    %c0_2 = arith.constant 0 : index
    %2 = vector.load %arg2[%c0_1, %c0_2] : memref<768x64xbf16, #tpu.memory_space<vmem>>, vector<768x64xbf16>
    %cst = arith.constant dense<0.000000e+00> : vector<8x64xf32>
    %3 = tpu.matmul %1, %2, %cst {dimension_numbers = #tpu.dot_dimension_numbers<[1], [0], [0], [1], [0, 0, 1, 1], [], []>} : vector<8x768xbf16>, vector<768x64xbf16>, vector<8x64xf32> -> vector<8x64xf32>
    %c0_3 = arith.constant 0 : index
    %c0_4 = arith.constant 0 : index
    %4 = vector.load %arg3[%c0_3, %c0_4] : memref<1x64xf32, #tpu.memory_space<vmem>>, vector<1x64xf32>
    %5 = vector.broadcast %4 : vector<1x64xf32> to vector<8x64xf32>
    %6 = arith.addf %3, %5 : vector<8x64xf32>
    %cst_5 = arith.constant dense<0.000000e+00> : vector<8xf32>
    %7 = vector.multi_reduction <add>, %6, %cst_5 [1] : vector<8x64xf32> to vector<8xf32>
    %8 = vector.shape_cast %7 : vector<8xf32> to vector<8x1xf32>
    %cst_6 = arith.constant 6.400000e+01 : f32
    %9 = vector.broadcast %cst_6 : f32 to vector<8x1xf32>
    %10 = arith.divf %8, %9 : vector<8x1xf32>
    %11 = vector.broadcast %10 : vector<8x1xf32> to vector<8x64xf32>
    %12 = arith.subf %6, %11 : vector<8x64xf32>
    %13 = arith.mulf %12, %12 : vector<8x64xf32>
    %cst_7 = arith.constant dense<0.000000e+00> : vector<8xf32>
    %14 = vector.multi_reduction <add>, %13, %cst_7 [1] : vector<8x64xf32> to vector<8xf32>
    %15 = vector.shape_cast %14 : vector<8xf32> to vector<8x1xf32>
    %cst_8 = arith.constant 6.400000e+01 : f32
    %16 = vector.broadcast %cst_8 : f32 to vector<8x1xf32>
    %17 = arith.divf %15, %16 : vector<8x1xf32>
    %cst_9 = arith.constant 9.99999974E-6 : f32
    %18 = vector.broadcast %cst_9 : f32 to vector<8x1xf32>
    %19 = arith.addf %17, %18 : vector<8x1xf32>
    %20 = math.rsqrt %19 : vector<8x1xf32>
    %21 = vector.broadcast %20 : vector<8x1xf32> to vector<8x64xf32>
    %22 = arith.mulf %12, %21 : vector<8x64xf32>
    %c0_10 = arith.constant 0 : index
    %c0_11 = arith.constant 0 : index
    %23 = vector.load %arg4[%c0_10, %c0_11] : memref<1x64xf32, #tpu.memory_space<vmem>>, vector<1x64xf32>
    %24 = vector.broadcast %23 : vector<1x64xf32> to vector<8x64xf32>
    %25 = arith.mulf %22, %24 : vector<8x64xf32>
    %c0_12 = arith.constant 0 : index
    %c0_13 = arith.constant 0 : index
    %26 = vector.load %arg5[%c0_12, %c0_13] : memref<1x64xf32, #tpu.memory_space<vmem>>, vector<1x64xf32>
    %27 = vector.broadcast %26 : vector<1x64xf32> to vector<8x64xf32>
    %28 = arith.addf %25, %27 : vector<8x64xf32>
    %29 = math.tanh %28 : vector<8x64xf32>
    %30 = arith.truncf %29 : vector<8x64xf32> to vector<8x64xbf16>
    %c0_14 = arith.constant 0 : index
    %c0_15 = arith.constant 0 : index
    %31 = vector.load %arg6[%c0_14, %c0_15] : memref<64x2xbf16, #tpu.memory_space<vmem>>, vector<64x2xbf16>
    %cst_16 = arith.constant dense<0.000000e+00> : vector<8x2xf32>
    %32 = tpu.matmul %30, %31, %cst_16 {dimension_numbers = #tpu.dot_dimension_numbers<[1], [0], [0], [1], [0, 0, 1, 1], [], []>} : vector<8x64xbf16>, vector<64x2xbf16>, vector<8x2xf32> -> vector<8x2xf32>
    %c0_17 = arith.constant 0 : index
    %c0_18 = arith.constant 0 : index
    %33 = vector.load %arg7[%c0_17, %c0_18] : memref<1x2xf32, #tpu.memory_space<vmem>>, vector<1x2xf32>
    %34 = vector.broadcast %33 : vector<1x2xf32> to vector<8x2xf32>
    %35 = arith.addf %32, %34 : vector<8x2xf32>
    %c0_19 = arith.constant 0 : index
    %c0_20 = arith.constant 0 : index
    %36 = vector.load %arg8[%c0_19, %c0_20] : memref<8x2xf32, #tpu.memory_space<vmem>>, vector<8x2xf32>
    tpu.vector_store %arg8[%c0_19, %c0_20], %35 {strides = array<i32>} : memref<8x2xf32, #tpu.memory_space<vmem>>, vector<8x2xf32>,
    return
  }
  func.func @transform_0(%arg0: i32) -> (i32, i32) {
    %c0_i32 = arith.constant 0 : i32
    %c0_i32_0 = arith.constant 0 : i32
    return %arg0, %c0_i32 : i32, i32
  }
  func.func @transform_1(%arg0: i32) -> (i32, i32) {
    %c0_i32 = arith.constant 0 : i32
    %c0_i32_0 = arith.constant 0 : i32
    %c0_i32_1 = arith.constant 0 : i32
    return %c0_i32, %c0_i32_0 : i32, i32
  }
  func.func @transform_2(%arg0: i32) -> (i32, i32) {
    %c0_i32 = arith.constant 0 : i32
    %c0_i32_0 = arith.constant 0 : i32
    %c0_i32_1 = arith.constant 0 : i32
    return %c0_i32, %c0_i32_0 : i32, i32
  }
  func.func @transform_3(%arg0: i32) -> (i32, i32) {
    %c0_i32 = arith.constant 0 : i32
    %c0_i32_0 = arith.constant 0 : i32
    %c0_i32_1 = arith.constant 0 : i32
    return %c0_i32, %c0_i32_0 : i32, i32
  }
  func.func @transform_4(%arg0: i32) -> (i32, i32) {
    %c0_i32 = arith.constant 0 : i32
    %c0_i32_0 = arith.constant 0 : i32
    %c0_i32_1 = arith.constant 0 : i32
    return %c0_i32, %c0_i32_0 : i32, i32
  }
  func.func @transform_5(%arg0: i32) -> (i32, i32) {
    %c0_i32 = arith.constant 0 : i32
    %c0_i32_0 = arith.constant 0 : i32
    %c0_i32_1 = arith.constant 0 : i32
    return %c0_i32, %c0_i32_0 : i32, i32
  }
  func.func @transform_6(%arg0: i32) -> (i32, i32) {
    %c0_i32 = arith.constant 0 : i32
    %c0_i32_0 = arith.constant 0 : i32
    %c0_i32_1 = arith.constant 0 : i32
    return %c0_i32, %c0_i32_0 : i32, i32
  }
  func.func @transform_7(%arg0: i32) -> (i32, i32) {
    %c0_i32 = arith.constant 0 : i32
    %c0_i32_0 = arith.constant 0 : i32
    return %arg0, %c0_i32 : i32, i32
  }
}

</mosaic_0001>

<bundles_post_ra>
// kernel: tpu_custom_call.1
= control target key start
LH: loop header
LB: loop body
LE: loop exit
PB: predicated region body
PF: predicated region fallthrough
CT: control target
= control target key end

     0   :  { %vm505_vm0 = vcmask 523264   ;;  %vm599_vm5 = vcmask 15360   ;;  %s1110_s1 = inlined_call_operand.vmem [shape: bf16[768,64], index: 1, kind: input, shape index: {}]   ;;  %s1111_s2 = inlined_call_operand.vmem [shape: f32[1,64], index: 2, kind: input, shape index: {}]   ;;  %s1112_s0 = inlined_call_operand.vmem [shape: f32[8,768], index: 0, kind: input, shape index: {}]   ;;  %s1113_s3 = inlined_call_operand.vmem [shape: f32[1,64], index: 3, kind: input, shape index: {}]   ;;  %s1114_s4 = inlined_call_operand.vmem [shape: f32[1,64], index: 4, kind: input, shape index: {}]   ;;  %s1115_s6 = inlined_call_operand.vmem [shape: f32[1,2], index: 6, kind: input, shape index: {}]   ;;  %s1116_s5 = inlined_call_operand.vmem [shape: bf16[64,2], index: 5, kind: input, shape index: {}]   ;;  %s1117_s7 = inlined_call_operand.vmem [shape: f32[8,2], index: 7, kind: output, shape index: {}]  }
   0x1   :  { %v821_v0 = vld [vmem:[%s1110_s1 + $0x38] sm:$0xff]  ;;  %v820_v2 = vld [vmem:[%s1110_s1 + $0x30] sm:$0xff]  ;;  %v819_v8 = vld [vmem:[%s1110_s1 + $0x28] sm:$0xff] }
   0x2   :  { %v829_v1 = vld [vmem:[%s1110_s1 + $0x78] sm:$0xff]  ;;  %427 = vmatpush.bf16.msra.mxu0 %v821_v0  ;;  %v828_v3 = vld [vmem:[%s1110_s1 + $0x70] sm:$0xff]  ;;  %v827_v9 = vld [vmem:[%s1110_s1 + $0x68] sm:$0xff] }
   0x3   :  { %440 = vmatpush.bf16.msra.mxu1 %v829_v1  ;;  %v837_v4 = vld [vmem:[%s1110_s1 + $0xb8] sm:$0xff]  ;;  %v836_v6 = vld [vmem:[%s1110_s1 + $0xb0] sm:$0xff]  ;;  %v835_v10 = vld [vmem:[%s1110_s1 + $0xa8] sm:$0xff] }
   0x4   :  { %v845_v5 = vld [vmem:[%s1110_s1 + $0xf8] sm:$0xff]  ;;  %453 = vmatpush.bf16.msra.mxu2 %v837_v4  ;;  %v844_v7 = vld [vmem:[%s1110_s1 + $0xf0] sm:$0xff]  ;;  %v843_v11 = vld [vmem:[%s1110_s1 + $0xe8] sm:$0xff] }
   0x5   :  { %466 = vmatpush.bf16.msra.mxu3 %v845_v5  ;;  %v818_v12 = vld [vmem:[%s1110_s1 + $0x20] sm:$0xff]  ;;  %v817_v16 = vld [vmem:[%s1110_s1 + $0x18] sm:$0xff]  ;;  %v816_v20 = vld [vmem:[%s1110_s1 + $0x10] sm:$0xff] }
   0x6   :  { %428 = vmatpush.bf16.msra.mxu0 %v820_v2  ;;  %v826_v13 = vld [vmem:[%s1110_s1 + $0x60] sm:$0xff]  ;;  %v825_v17 = vld [vmem:[%s1110_s1 + $0x58] sm:$0xff]  ;;  %v824_v21 = vld [vmem:[%s1110_s1 + $0x50] sm:$0xff] }
   0x7   :  { %441 = vmatpush.bf16.msra.mxu1 %v828_v3  ;;  %v834_v14 = vld [vmem:[%s1110_s1 + $0xa0] sm:$0xff]  ;;  %v833_v18 = vld [vmem:[%s1110_s1 + $0x98] sm:$0xff]  ;;  %v832_v22 = vld [vmem:[%s1110_s1 + $0x90] sm:$0xff] }
   0x8   :  { %454 = vmatpush.bf16.msra.mxu2 %v836_v6  ;;  %v842_v15 = vld [vmem:[%s1110_s1 + $0xe0] sm:$0xff]  ;;  %v841_v19 = vld [vmem:[%s1110_s1 + $0xd8] sm:$0xff]  ;;  %v840_v23 = vld [vmem:[%s1110_s1 + $0xd0] sm:$0xff] }
   0x9   :  { %467 = vmatpush.bf16.msra.mxu3 %v844_v7  ;;  %v815_v24 = vld [vmem:[%s1110_s1 + $0x8] sm:$0xff]  ;;  %v814_v27 = vld [vmem:[%s1110_s1] sm:$0xff]  ;;  %v853_v32 = vld [vmem:[%s1110_s1 + $0x138] sm:$0xff] }
   0xa   :  { %429 = vmatpush.bf16.msra.mxu0 %v819_v8  ;;  %v823_v25 = vld [vmem:[%s1110_s1 + $0x48] sm:$0xff]  ;;  %v822_v29 = vld [vmem:[%s1110_s1 + $0x40] sm:$0xff]  ;;  %v861_v33 = vld [vmem:[%s1110_s1 + $0x178] sm:$0xff] }
   0xb   :  { %442 = vmatpush.bf16.msra.mxu1 %v827_v9  ;;  %v831_v26 = vld [vmem:[%s1110_s1 + $0x88] sm:$0xff]  ;;  %v27_v30 = vld [vmem:[%s1112_s0] sm:$0xff]  ;;  %v29_v37 = vld [vmem:[%s1112_s0 + $0x10] sm:$0xff] }
   0xc   :  { %455 = vmatpush.bf16.msra.mxu2 %v835_v10  ;;  %v839_v28 = vld [vmem:[%s1110_s1 + $0xc8] sm:$0xff]  ;;  %v830_v34 = vld [vmem:[%s1110_s1 + $0x80] sm:$0xff]  ;;  %v33_v35 = vpack.c.bf16 %v27_v30, %v27_v30  ;;  %v30_v39 = vld [vmem:[%s1112_s0 + $0x18] sm:$0xff]  ;;  %v35_v42 = vpack.c.bf16 %v29_v37, %v29_v37 }
   0xd   :  { %468 = vmatpush.bf16.msra.mxu3 %v843_v11  ;;  %v28_v31 = vld [vmem:[%s1112_s0 + $0x8] sm:$0xff]  ;;  %v838_v38 = vld [vmem:[%s1110_s1 + $0xc0] sm:$0xff]  ;;  %v852_v40 = vld [vmem:[%s1110_s1 + $0x130] sm:$0xff]  ;;  %v36_v43 = vpack.c.bf16 %v30_v39, %v30_v39 }
   0xe   :  { %430 = vmatpush.bf16.msra.mxu0 %v818_v12  ;;  %v34_v36 = vpack.c.bf16 %v28_v31, %v28_v31  ;;  %v860_v41 = vld [vmem:[%s1110_s1 + $0x170] sm:$0xff]  ;;  %v851_v44 = vld [vmem:[%s1110_s1 + $0x128] sm:$0xff]  ;;  %v850_v46 = vld [vmem:[%s1110_s1 + $0x120] sm:$0xff] }
   0xf   :  { %443 = vmatpush.bf16.msra.mxu1 %v826_v13  ;;  %v859_v45 = vld [vmem:[%s1110_s1 + $0x168] sm:$0xff]  ;;  %v858_v47 = vld [vmem:[%s1110_s1 + $0x160] sm:$0xff]  ;;  %v849_v48 = vld [vmem:[%s1110_s1 + $0x118] sm:$0xff] }
  0x10   :  { %456 = vmatpush.bf16.msra.mxu2 %v834_v14  ;;  %v857_v49 = vld [vmem:[%s1110_s1 + $0x158] sm:$0xff]  ;;  %v848_v50 = vld [vmem:[%s1110_s1 + $0x110] sm:$0xff]  ;;  %v847_v52 = vld [vmem:[%s1110_s1 + $0x108] sm:$0xff] }
  0x11   :  { %469 = vmatpush.bf16.msra.mxu3 %v842_v15  ;;  %v856_v51 = vld [vmem:[%s1110_s1 + $0x150] sm:$0xff]  ;;  %v855_v53 = vld [vmem:[%s1110_s1 + $0x148] sm:$0xff]  ;;  %v846_v54 = vld [vmem:[%s1110_s1 + $0x100] sm:$0xff] }
  0x12   :  { %431 = vmatpush.bf16.msra.mxu0 %v817_v16  ;;  %v854_v55 = vld [vmem:[%s1110_s1 + $0x140] sm:$0xff]  ;;  %v32_v57 = vld [vmem:[%s1112_s0 + $0x28] sm:$0xff]  ;;  %v877_v16 = vmov 64.0  }
  0x13   :  { %444 = vmatpush.bf16.msra.mxu1 %v825_v17  ;;  %v31_v56 = vld [vmem:[%s1112_s0 + $0x20] sm:$0xff]  ;;  %v38_v59 = vpack.c.bf16 %v32_v57, %v32_v57  ;;  %871 = vrcp.f32 %v877_v16  ;;  %v863_v30 = vld [vmem:[%s1116_s5 + $0x8] sm:$0xff] }
  0x14   :  { %457 = vmatpush.bf16.msra.mxu2 %v833_v18  ;;  %v37_v58 = vpack.c.bf16 %v31_v56, %v31_v56  ;;  %v867_v2 = vld [vmem:[%s1111_s2] ss:$0 sm:$0xff] }
  0x15   :  { %470 = vmatpush.bf16.msra.mxu3 %v841_v19  ;;  %v862_v31 = vld [vmem:[%s1116_s5] sm:$0xff] }
  0x16   :  { %432 = vmatpush.bf16.msra.mxu0 %v816_v20 }
  0x17   :  { %445 = vmatpush.bf16.msra.mxu1 %v824_v21 }
  0x18   :  { %458 = vmatpush.bf16.msra.mxu2 %v832_v22 }
  0x19   :  { %471 = vmatpush.bf16.msra.mxu3 %v840_v23  ;;  %v872_v17 = vpop.eup %871 }
  0x1a   :  { %433 = vmatpush.bf16.msra.mxu0 %v815_v24  ;;  %v510_v18 = vmul.f32 64.0, %v872_v17  ;;  %vm514_vm1 = vweird.f32 %v872_v17 }
  0x1b   :  { %446 = vmatpush.bf16.msra.mxu1 %v823_v25 }
  0x1c   :  { %459 = vmatpush.bf16.msra.mxu2 %v831_v26  ;;  %v511_v19 = vsub.f32 1.0, %v510_v18 }
  0x1d   :  { %472 = vmatpush.bf16.msra.mxu3 %v839_v28  ;;  %v865_v28 = vld [vmem:[%s1116_s5 + $0x18] sm:$0xff] }
  0x1e   :  { %434 = vmatpush.bf16.msra.mxu0 %v814_v27  ;;  %v512_v20 = vmul.f32 %v872_v17, %v511_v19 }
  0x1f   :  { %447 = vmatpush.bf16.msra.mxu1 %v822_v29  ;;  %v864_v29 = vld [vmem:[%s1116_s5 + $0x10] sm:$0xff] }
  0x20   :  { %460 = vmatpush.bf16.msra.mxu2 %v830_v34  ;;  %v513_v21 = vadd.f32 %v872_v17, %v512_v20 }
  0x21   :  { %435 = vmatmul.bf16.vlgmr.msra.gmra.mxu0 %v33_v35  ;;  %473 = vmatpush.bf16.msra.mxu3 %v838_v38 }
  0x22   :  { %479 = vmatpush.bf16.msrb.mxu0 %v853_v32  ;;  %448 = vmatmul.bf16.vlgmr.msra.gmra.mxu1 %v34_v36  ;;  %v515_v22 = vsel %vm514_vm1, %v872_v17, %v513_v21 }
  0x23   :  { %492 = vmatpush.bf16.msrb.mxu1 %v861_v33  ;;  %461 = vmatmul.bf16.vlgmr.msra.gmra.mxu2 %v35_v42 }
  0x24   :  { %474 = vmatmul.bf16.vlgmr.msra.gmra.mxu3 %v36_v43  ;;  %590 = vmatpush.bf16.msrb.mxu2 %v865_v28 }
  0x26   :  { %480 = vmatpush.bf16.msrb.mxu0 %v852_v40 }
  0x27   :  { %493 = vmatpush.bf16.msrb.mxu1 %v860_v41  ;;  %v868_v41 = vld [vmem:[%s1113_s3] ss:$0 sm:$0xff] }
  0x28   :  { %591 = vmatpush.bf16.msrb.mxu2 %v864_v29 }
  0x2a   :  { %481 = vmatpush.bf16.msrb.mxu0 %v851_v44  ;;  %v869_v44 = vld [vmem:[%s1114_s4] ss:$0 sm:$0xff] }
  0x2b   :  { %494 = vmatpush.bf16.msrb.mxu1 %v859_v45 }
  0x2c   :  { %592 = vmatpush.bf16.msrb.mxu2 %v863_v30 }
  0x2e   :  { %482 = vmatpush.bf16.msrb.mxu0 %v850_v46 }
  0x2f   :  { %495 = vmatpush.bf16.msrb.mxu1 %v858_v47 }
  0x30   :  { %593 = vmatpush.bf16.msrb.mxu2 %v862_v31 }
  0x32   :  { %483 = vmatpush.bf16.msrb.mxu0 %v849_v48 }
  0x33   :  { %496 = vmatpush.bf16.msrb.mxu1 %v857_v49  ;;  %v870_v49 = vld [vmem:[%s1115_s6] ss:$0 sm:$0xff] }
  0x36   :  { %484 = vmatpush.bf16.msrb.mxu0 %v848_v50 }
  0x37   :  { %497 = vmatpush.bf16.msrb.mxu1 %v856_v51 }
  0x3a   :  { %485 = vmatpush.bf16.msrb.mxu0 %v847_v52 }
  0x3b   :  { %498 = vmatpush.bf16.msrb.mxu1 %v855_v53 }
  0x3e   :  { %486 = vmatpush.bf16.msrb.mxu0 %v846_v54 }
  0x3f   :  { %499 = vmatpush.bf16.msrb.mxu1 %v854_v55 }
  0x41   :  { %487 = vmatmul.bf16.vlgmr.msrb.gmra.mxu0 %v37_v58 }
  0x42   :  { %500 = vmatmul.bf16.vlgmr.msrb.gmra.mxu1 %v38_v59 }
  0x9e   :  { %v436_v60 = vpop.f32.mrf.mxu0 }
  0x9f   :  { %v449_v61 = vpop.f32.mrf.mxu1  ;;  %v437_v3 = vadd.f32 %v867_v2, %v436_v60 }
  0xa1   :  { %v450_v6 = vadd.f32 %v449_v61, %v437_v3 }
  0xa6   :  { %v438_v62 = vpop.f32.mrf.mxu0  ;;  %v462_v0 = vpop.f32.mrf.mxu2 }
  0xa7   :  { %v451_v63 = vpop.f32.mrf.mxu1  ;;  %v475_v1 = vpop.f32.mrf.mxu3  ;;  %v463_v7 = vadd.f32 %v462_v0, %v450_v6 }
  0xa9   :  { %v476_v8 = vadd.f32 %v475_v1, %v463_v7 }
  0xae   :  { %v464_v4 = vpop.f32.mrf.mxu2 }
  0xaf   :  { %v477_v5 = vpop.f32.mrf.mxu3 }
  0xbe   :  { %v488_v9 = vpop.f32.mrf.mxu0 }
  0xbf   :  { %v501_v10 = vpop.f32.mrf.mxu1  ;;  %v489_v11 = vadd.f32 %v488_v9, %v476_v8 }
  0xc1   :  { %v502_v12 = vadd.f32 %v501_v10, %v489_v11 }
  0xc3   :  { %v506_v13 = vsel %vm505_vm0, %v502_v12, 0.0 }
  0xc4   :  { %507 = vadd.xlane.f32.xlu0 %v506_v13 }
  0xc6   :  { %v490_v14 = vpop.f32.mrf.mxu0 }
  0xc7   :  { %v503_v15 = vpop.f32.mrf.mxu1 }
 0x137   :  { %v508_v23 = vpop.xlane.xlu0 %507 }
 0x138   :  { %v516_v24 = vmul.f32 %v515_v22, %v508_v23 }
 0x13a   :  { %v517_v25 = vsub.f32 %v502_v12, %v516_v24 }
 0x13c   :  { %v518_v26 = vmul.f32 %v517_v25, %v517_v25 }
 0x13e   :  { %v519_v27 = vsel %vm505_vm0, %v518_v26, 0.0 }
 0x13f   :  { %520 = vadd.xlane.f32.xlu0 %v519_v27 }
 0x1b2   :  { %v521_v32 = vpop.xlane.xlu0 %520 }
 0x1b3   :  { %v522_v33 = vmul.f32 %v521_v32, %v515_v22 }
 0x1b5   :  { %v523_v34 = vadd.f32 1e-05, %v522_v33 }
 0x1b7   :  { %873 = vrsqrt.f32 %v523_v34  ;;  %vm530_vm3 = vweird.f32 %v523_v34 }
 0x1bd   :  { %v874_v35 = vpop.eup %873 }
 0x1be   :  { %v525_v36 = vmul.f32 %v874_v35, %v523_v34  ;;  %vm531_vm2 = vweird.f32 %v874_v35 }
 0x1bf   :  { %vm532_vm4 = vmor %vm530_vm3, %vm531_vm2 }
 0x1c0   :  { %v526_v37 = vmul.f32 %v874_v35, %v525_v36 }
 0x1c2   :  { %v527_v38 = vmul.f32 0.5, %v526_v37 }
 0x1c4   :  { %v528_v39 = vsub.f32 1.5, %v527_v38 }
 0x1c6   :  { %v529_v40 = vmul.f32 %v874_v35, %v528_v39 }
 0x1c8   :  { %v533_v42 = vsel %vm532_vm4, %v874_v35, %v529_v40 }
 0x1c9   :  { %v534_v43 = vmul.f32 %v533_v42, %v517_v25 }
 0x1cb   :  { %v539_v45 = vmul.f32 %v868_v41, %v534_v43 }
 0x1cd   :  { %v544_v46 = vadd.f32 %v869_v44, %v539_v45 }
 0x1cf   :  { %875 = vtanh.f32 %v544_v46 }
 0x1d5   :  { %v876_v47 = vpop.eup %875 }
 0x1d6   :  { %v546_v48 = vpack.c.bf16 %v876_v47, %v876_v47 }
 0x1d8   :  { %813 = vmatmul.msk.bf16.vlgmr.msrb.gmra.mxu2 %vm505_vm0, %v546_v48 }
 0x25b   :  { %v595_v50 = vpop.f32.mrf.mxu2 }
 0x25c   :  { %v596_v51 = vadd.f32 %v870_v49, %v595_v50 }
 0x25e   :  { %600 = vst.msk [vmem:[%s1117_s7] sm:$0xff] %vm599_vm5, %v596_v51 }
 0x263   :  { %v597_v52 = vpop.f32.mrf.mxu2 }

</bundles_post_ra>
